<compile_context>
chip_gen: v6e
topology: v6e:2x2x1
jax: 0.10.0
libtpu: 0.0.40
codegen_flags: <defaults>
</compile_context>

<pallas_src>
import jax
import jax.numpy as jnp
from jax.experimental import pallas as pl
from jax.experimental.pallas import tpu as pltpu

_LANE = 128


def _msd_kernel(a_ref, x_ref, o_ref):
    # a_ref: (2, 2) f32 in SMEM (scalar reads only).
    # x_ref / o_ref: (2, TILE_S, 128) blocks in VMEM.
    x0 = x_ref[0].astype(jnp.float32)          # (TILE_S, 128) position slab
    x1 = x_ref[1].astype(jnp.float32)          # (TILE_S, 128) velocity slab

    a00 = a_ref[0, 0]
    a01 = a_ref[0, 1]
    a10 = a_ref[1, 0]
    a11 = a_ref[1, 1]

    # General 2x2 operator: 4 scalar-broadcast muls + 2 adds per block.
    o_ref[0] = (a00 * x0 + a01 * x1).astype(o_ref.dtype)   # = x1 for canonical A
    o_ref[1] = (a10 * x0 + a11 * x1).astype(o_ref.dtype)   # = -(k/m)x0 - (b/m)x1


def _round_up(v, m):
    return ((v + m - 1) // m) * m


def mass_spring_damper_forward(t, x, A):
    """dx = A @ x computed in a Pallas TPU kernel on the VPU.

    `t` is accepted (ODE-solver signature) but unused, exactly like the
    PyTorch module's forward. `x` is (2, N); `A` is (2, 2).
    """
    del t  # unused, matching the reference module
    s_dim, N = x.shape
    assert s_dim == 2 and A.shape == (2, 2), "MassSpringDamper expects (2, N) state"

    # Pad the batch once to a lane multiple, then do a free metadata reshape
    # to (2, S, 128) so blocks are sublane- AND lane-dense.
    n_pad = _round_up(max(N, 1), _LANE)
    x_p = jnp.pad(x, ((0, 0), (0, n_pad - N))) if n_pad != N else x
    S = n_pad // _LANE
    x3 = x_p.reshape(2, S, _LANE)

    # Tile size along the 128-lane-groups axis.
    #   * 2048 rows -> 2 MiB f32 block; double-buffered in+out = 8 MiB, under
    #     the v5e 16 MiB / v6e 32 MiB / v7x 32 MiB default scoped-VMEM limits.
    #   * For 8 < S <= 2*MAX we split into >= 2 grid steps so the "parallel"
    #     axis can actually shard across v7x's two TensorCores.
    MAX_TILE_S = 2048
    if S <= 8:
        tile_s = S                                        # single full-extent block
    else:
        tile_s = min(MAX_TILE_S, _round_up(pl.cdiv(S, 2), 8))
    grid = (pl.cdiv(S, tile_s),)

    out3 = pl.pallas_call(
        _msd_kernel,
        out_shape=jax.ShapeDtypeStruct((2, S, _LANE), x.dtype),
        grid=grid,
        in_specs=[
            # 2x2 coefficient matrix, whole array in SMEM.
            pl.BlockSpec(memory_space=pltpu.MemorySpace.SMEM),
            # Dense state block, tiled along the lane-group axis.
            pl.BlockSpec((2, tile_s, _LANE), lambda i: (0, i, 0)),
        ],
        out_specs=pl.BlockSpec((2, tile_s, _LANE), lambda i: (0, i, 0)),
        compiler_params=pltpu.CompilerParams(
            dimension_semantics=("parallel",),
        ),
    )(A.astype(jnp.float32), x3)

    # Undo the padding/reshape (metadata only + one cheap slice).
    return out3.reshape(2, n_pad)[:, :N]


def make_A(m=1.0, k=1.0, b=0.5):
    # Deterministic parameter construction, mirroring MassSpringDamper.__init__.
    return jnp.array([[0.0, 1.0], [-k / m, -b / m]], dtype=jnp.float32)


if __name__ == "__main__":
    key = jax.random.PRNGKey(0)
    batch = 8
    x = jax.random.normal(key, (2, batch), dtype=jnp.float32)  # (state=2, batch)
    t = jnp.float32(0.0)

    A = make_A(m=1.0, k=1.0, b=0.5)

    dx = mass_spring_damper_forward(t, x, A)
    dx = jax.block_until_ready(dx)

    # Correctness check against plain-JAX reference of torch's A.mm(x).
    ref = A @ x
    assert dx.shape == (2, batch)
    assert jnp.allclose(dx, ref, atol=1e-6, rtol=1e-6), "mismatch vs reference"

    print("KERNEL_OK")
</pallas_src>

<mosaic_0001>
module attributes {stable_mosaic.version = 11 : i64} {
  func.func @_msd_kernel(%arg0: i32, %arg1: memref<2x2xf32, #tpu.memory_space<smem>>, %arg2: memref<2x1x128xf32, #tpu.memory_space<vmem>>, %arg3: memref<2x1x128xf32, #tpu.memory_space<vmem>>) attributes {dimension_semantics = [#tpu.dimension_semantics<parallel>], iteration_bounds = array<i64: 1>, scalar_prefetch = 0 : i64, scratch_operands = 0 : i64, tpu.core_type = #tpu.core_type<tc>, window_params = [{transform_indices = @transform_0, window_bounds = array<i64: 2, 2>}, {transform_indices = @transform_1, window_bounds = array<i64: 2, 1, 128>}, {transform_indices = @transform_2, window_bounds = array<i64: 2, 1, 128>}]} {
    %c0 = arith.constant 0 : index
    %c0_0 = arith.constant 0 : index
    %c0_1 = arith.constant 0 : index
    %0 = vector.load %arg2[%c0, %c0_0, %c0_1] : memref<2x1x128xf32, #tpu.memory_space<vmem>>, vector<1x1x128xf32>
    %1 = vector.shape_cast %0 : vector<1x1x128xf32> to vector<1x128xf32>
    %c1 = arith.constant 1 : index
    %c0_2 = arith.constant 0 : index
    %c0_3 = arith.constant 0 : index
    %2 = vector.load %arg2[%c1, %c0_2, %c0_3] : memref<2x1x128xf32, #tpu.memory_space<vmem>>, vector<1x1x128xf32>
    %3 = vector.shape_cast %2 : vector<1x1x128xf32> to vector<1x128xf32>
    %c0_4 = arith.constant 0 : index
    %c0_5 = arith.constant 0 : index
    %4 = memref.load %arg1[%c0_4, %c0_5] : memref<2x2xf32, #tpu.memory_space<smem>>
    %c0_6 = arith.constant 0 : index
    %c1_7 = arith.constant 1 : index
    %5 = memref.load %arg1[%c0_6, %c1_7] : memref<2x2xf32, #tpu.memory_space<smem>>
    %c1_8 = arith.constant 1 : index
    %c0_9 = arith.constant 0 : index
    %6 = memref.load %arg1[%c1_8, %c0_9] : memref<2x2xf32, #tpu.memory_space<smem>>
    %c1_10 = arith.constant 1 : index
    %c1_11 = arith.constant 1 : index
    %7 = memref.load %arg1[%c1_10, %c1_11] : memref<2x2xf32, #tpu.memory_space<smem>>
    %8 = vector.broadcast %4 : f32 to vector<1x128xf32>
    %9 = arith.mulf %8, %1 : vector<1x128xf32>
    %10 = vector.broadcast %5 : f32 to vector<1x128xf32>
    %11 = arith.mulf %10, %3 : vector<1x128xf32>
    %12 = arith.addf %9, %11 : vector<1x128xf32>
    %c0_12 = arith.constant 0 : index
    %c0_13 = arith.constant 0 : index
    %c0_14 = arith.constant 0 : index
    %13 = vector.load %arg3[%c0_12, %c0_13, %c0_14] : memref<2x1x128xf32, #tpu.memory_space<vmem>>, vector<1x1x128xf32>
    %14 = vector.shape_cast %13 : vector<1x1x128xf32> to vector<1x128xf32>
    %15 = vector.shape_cast %12 : vector<1x128xf32> to vector<1x1x128xf32>
    tpu.vector_store %arg3[%c0_12, %c0_13, %c0_14], %15 {strides = array<i32>} : memref<2x1x128xf32, #tpu.memory_space<vmem>>, vector<1x1x128xf32>,
    %16 = vector.broadcast %6 : f32 to vector<1x128xf32>
    %17 = arith.mulf %16, %1 : vector<1x128xf32>
    %18 = vector.broadcast %7 : f32 to vector<1x128xf32>
    %19 = arith.mulf %18, %3 : vector<1x128xf32>
    %20 = arith.addf %17, %19 : vector<1x128xf32>
    %c1_15 = arith.constant 1 : index
    %c0_16 = arith.constant 0 : index
    %c0_17 = arith.constant 0 : index
    %21 = vector.load %arg3[%c1_15, %c0_16, %c0_17] : memref<2x1x128xf32, #tpu.memory_space<vmem>>, vector<1x1x128xf32>
    %22 = vector.shape_cast %21 : vector<1x1x128xf32> to vector<1x128xf32>
    %23 = vector.shape_cast %20 : vector<1x128xf32> to vector<1x1x128xf32>
    tpu.vector_store %arg3[%c1_15, %c0_16, %c0_17], %23 {strides = array<i32>} : memref<2x1x128xf32, #tpu.memory_space<vmem>>, vector<1x1x128xf32>,
    return
  }
  func.func @transform_0(%arg0: i32) -> (i32, i32) {
    %c0_i32 = arith.constant 0 : i32
    %c0_i32_0 = arith.constant 0 : i32
    %c0_i32_1 = arith.constant 0 : i32
    return %c0_i32, %c0_i32_0 : i32, i32
  }
  func.func @transform_1(%arg0: i32) -> (i32, i32, i32) {
    %c0_i32 = arith.constant 0 : i32
    %c0_i32_0 = arith.constant 0 : i32
    %c0_i32_1 = arith.constant 0 : i32
    return %c0_i32, %arg0, %c0_i32_0 : i32, i32, i32
  }
  func.func @transform_2(%arg0: i32) -> (i32, i32, i32) {
    %c0_i32 = arith.constant 0 : i32
    %c0_i32_0 = arith.constant 0 : i32
    %c0_i32_1 = arith.constant 0 : i32
    return %c0_i32, %arg0, %c0_i32_0 : i32, i32, i32
  }
}

</mosaic_0001>

<bundles_post_ra>
// kernel: tpu_custom_call.1
= control target key start
LH: loop header
LB: loop body
LE: loop exit
PB: predicated region body
PF: predicated region fallthrough
CT: control target
= control target key end

     0   :  { %7 = vsyncpa [#allocation5], 0  ;;  %s172_s0 = inlined_call_operand.hbm [shape: f32[2,2], index: 0, kind: input, shape index: {}]   ;;  %s173_s1 = inlined_call_operand.hbm [shape: f32[2,1,128], index: 1, kind: input, shape index: {}]   ;;  %s174_s2 = inlined_call_operand.hbm [shape: f32[2,1,128], index: 2, kind: output, shape index: {}]  }
   0x1   :  { %8 = vsyncpa [#allocation3], 0 }
   0x2   :  { %9 = vsyncpa [#allocation4], 0  ;;  %s137_s9 = smov [#allocation2]   ;;  %s138_s12 = smov [#allocation6]  }
   0x3   :  { %17 = dma.hbm_to_smem %s172_s0, 32, %s137_s9, [#allocation5]  }
   0x4   :  { %s23_s13 = sshll.u32 %s138_s12, 4  ;;  %s24_s13 = int_to_ptr.vmem [resolvable:$true] %s23_s13 }
   0x5   :  { %s99_s14 = scalar_lea.vmem %s24_s13, 32  ;;  %p104_p1 = scmp.lt.s32.totalorder %s24_s13, %s24_s13 }
   0x6   :  { %p100_p0 = scmp.ne.s32.totalorder %s24_s13, %s99_s14  ;;  %p105_p2 = scmp.lt.s32.totalorder %s99_s14, %s99_s14 }
   0x8   :  { %p106_p3 = por %p105_p2, %p104_p1 }
   0xa   :  { %p107_p4 = pnand %p106_p3, %p100_p0 }
   0xc   :  { %110 = shalt.err (!%p107_p4)
}
   0xd   :  { %s139_s15 = smov 16   ;;  %s140_s16 = smov 1  }
   0xe   :  { %29 = dma.hbm_to_vmem [thread:$0]  %s173_s1, 32, %s24_s13, [#allocation3], %s139_s15, %s139_s15, %s140_s16  }
   0xf   :  { %131 = dma.done.wait [#allocation5], 32  }
  0x10   :  { %132 = vsyncadd [#allocation5], 4294967264 }
  0x11   :  { %133 = dma.done.wait [#allocation3], 32  }
  0x12   :  { %134 = vsyncadd [#allocation3], 4294967264 }
  0x13   :  { %36 = sfence }
  0x14   :  { %s40_s0 = sld [smem:[#allocation2]]  ;;  %v37_v0 = vld [vmem:[#allocation6] sm:$0x1]  ;;  %v39_v1 = vld [vmem:[#allocation6 + $0x1] sm:$0x1]  ;;  %s141_s22 = smov [#allocation7]  }
  0x15   :  { %s75_s19 = sld [smem:[#allocation2 + $0x1]]  ;;  %s62_s1 = sshll.u32 %s141_s22, 4  ;;  %s63_s1 = int_to_ptr.vmem [resolvable:$true] %s62_s1 }
  0x16   :  { %s76_s20 = sld [smem:[#allocation2 + $0x80]]  ;;  %s111_s23 = scalar_lea.vmem %s63_s1, 32 }
  0x17   :  { %s77_s21 = sld [smem:[#allocation2 + $0x81]]  ;;  %p112_p5 = scmp.ne.s32.totalorder %s63_s1, %s111_s23 }
  0x18   :  { %p116_p6 = scmp.lt.s32.totalorder %s63_s1, %s63_s1  ;;  %p117_p7 = scmp.lt.s32.totalorder %s111_s23, %s111_s23 }
  0x1a   :  { %v44_v2 = vstv %s40_s0  ;;  %p118_p8 = por %p117_p7, %p116_p6 }
  0x1b   :  { %v45_v3 = vmul.f32 %v44_v2, %v37_v0  ;;  %v46_v4 = vstv %s75_s19 }
  0x1c   :  { %v47_v5 = vmul.f32 %v46_v4, %v39_v1  ;;  %v50_v6 = vstv %s76_s20  ;;  %p119_p9 = pnand %p118_p8, %p112_p5 }
  0x1d   :  { %v51_v7 = vmul.f32 %v50_v6, %v37_v0  ;;  %v52_v8 = vstv %s77_s21 }
  0x1e   :  { %v48_v9 = vadd.f32 %v47_v5, %v45_v3  ;;  %v53_v10 = vmul.f32 %v52_v8, %v39_v1 }
  0x20   :  { %49 = vst [vmem:[#allocation7] sm:$0x1] %v48_v9  ;;  %v54_v11 = vadd.f32 %v53_v10, %v51_v7 }
  0x22   :  { %56 = vst [vmem:[#allocation7 + $0x1] sm:$0x1] %v54_v11 }
  0x23   :  { %122 = shalt.err (!%p119_p9)
}
  0x24   :  { %68 = dma.vmem_to_hbm [thread:$0]  %s63_s1, 32, %s174_s2, [#allocation4], %s139_s15, %s139_s15, %s140_s16  }
  0x25   :  { %135 = dma.done.wait [#allocation4], 32  }
  0x26   :  { %136 = vsyncadd [#allocation4], 4294967264 }
  0x27   :  { %72 = vsyncpa [#allocation3], 1 }
  0x28   :  { %73 = vsyncpa [#allocation4], 1 }
  0x29   :  { %74 = vsyncpa [#allocation5], 1 }

</bundles_post_ra>
